<compile_context>
chip_gen: v7x
topology: tpu7x:2x2x1
jax: 0.10.0
libtpu: 0.0.40
codegen_flags: <defaults>
</compile_context>

<pallas_src>
import functools

import jax
import jax.numpy as jnp
from jax.experimental import pallas as pl
from jax.experimental.pallas import tpu as pltpu


# ------------------------------ activations --------------------------------

_ACTIVATIONS = {
    None: lambda t: t,
    "relu": lambda t: jnp.maximum(t, 0.0),
    "tanh": jnp.tanh,
    "gelu": jax.nn.gelu,
    "sigmoid": jax.nn.sigmoid,
}


# ----------------------------- Pallas kernels ------------------------------

def _enc_dec_kernel(act_fn, x_ref, w1_ref, b1_ref, w2_ref, b2_ref, o_ref):
    """o = act(x @ W1 + b1) @ W2 + b2 for one row tile (bf16 MXU, f32 acc)."""
    x = x_ref[...].astype(jnp.bfloat16)                       # MXU-native operand
    h = jnp.dot(x, w1_ref[...], preferred_element_type=jnp.float32)
    h = act_fn(h + b1_ref[...])                               # f32 bias + activation
    y = jnp.dot(h.astype(jnp.bfloat16), w2_ref[...],
                preferred_element_type=jnp.float32)
    o_ref[...] = (y + b2_ref[...]).astype(o_ref.dtype)        # single downcast


def _linear_kernel(x_ref, w_ref, b_ref, o_ref):
    """o = x @ W + b  (hidden_size is None branch)."""
    x = x_ref[...].astype(jnp.bfloat16)
    y = jnp.dot(x, w_ref[...], preferred_element_type=jnp.float32)
    o_ref[...] = (y + b_ref[...]).astype(o_ref.dtype)


# ------------------------------ tiling helpers ------------------------------

def _sublane(dtype) -> int:
    """Minimum second-minor block alignment for the streamed dtype."""
    return max(8, 32 // jnp.dtype(dtype).itemsize)


def _row_tile(n_rows: int, dtype) -> int:
    """Large sublane-aligned row tile; the grid uses ceil-div and Pallas masks
    the ragged tail.  For small N we still aim for >= 2 grid steps so the row
    axis can shard across v7x's two TensorCores."""
    sub = _sublane(dtype)
    if n_rows >= 1024:
        return 512
    half = -(-n_rows // 2)
    return max(sub, ((half + sub - 1) // sub) * sub)


def _pad_lanes(d: int) -> int:
    """Round a feature dim up to a multiple of 128 so output stores are
    lane-dense (unmasked vst) rather than masked partial stores."""
    return 128 * pl.cdiv(d, 128)


# ------------------------------ JAX wrappers --------------------------------

@functools.partial(jax.jit, static_argnames=("activation",))
def linear_encoder_decoder(x, w1_t, b1, w2_t, b2, activation="relu"):
    """Fused Linear -> activation -> Linear.
    x: [..., D_in]; w1_t: [D_in, H]; b1: [H]; w2_t: [H, D_out]; b2: [D_out]."""
    act_fn = _ACTIVATIONS[activation]
    lead = x.shape[:-1]
    d_in = x.shape[-1]
    h = w1_t.shape[1]
    d_out = w2_t.shape[1]

    x2 = x.reshape(-1, d_in)
    n = x2.shape[0]
    tm = _row_tile(n, x2.dtype)
    grid_m = pl.cdiv(n, tm)

    # Lane-dense output: zero-pad D_out to a multiple of 128, slice afterwards.
    d_out_p = _pad_lanes(d_out)
    if d_out_p != d_out:
        w2_t = jnp.pad(w2_t, ((0, 0), (0, d_out_p - d_out)))
        b2 = jnp.pad(b2, (0, d_out_p - d_out))

    # bf16 MXU weight operands (half the weight DMA bytes); biases stay f32.
    w1_bf = w1_t.astype(jnp.bfloat16)
    w2_bf = w2_t.astype(jnp.bfloat16)
    b1_f = b1.astype(jnp.float32).reshape(1, h)
    b2_f = b2.astype(jnp.float32).reshape(1, d_out_p)

    out = pl.pallas_call(
        functools.partial(_enc_dec_kernel, act_fn),
        out_shape=jax.ShapeDtypeStruct((n, d_out_p), x.dtype),
        grid_spec=pltpu.PrefetchScalarGridSpec(
            num_scalar_prefetch=0,
            grid=(grid_m,),
            in_specs=[
                pl.BlockSpec((tm, d_in), lambda i: (i, 0)),     # streamed rows
                pl.BlockSpec((d_in, h), lambda i: (0, 0)),      # resident W1
                pl.BlockSpec((1, h), lambda i: (0, 0)),         # resident b1
                pl.BlockSpec((h, d_out_p), lambda i: (0, 0)),   # resident W2
                pl.BlockSpec((1, d_out_p), lambda i: (0, 0)),   # resident b2
            ],
            out_specs=pl.BlockSpec((tm, d_out_p), lambda i: (i, 0)),
        ),
        compiler_params=pltpu.CompilerParams(
            dimension_semantics=("parallel",)),
    )(x2, w1_bf, b1_f, w2_bf, b2_f)

    return out[:, :d_out].reshape(*lead, d_out)


@jax.jit
def linear_only(x, w_t, b):
    """hidden_size=None branch: plain Linear. x: [..., D_in]; w_t: [D_in, D_out]."""
    lead = x.shape[:-1]
    d_in = x.shape[-1]
    d_out = w_t.shape[1]

    x2 = x.reshape(-1, d_in)
    n = x2.shape[0]
    tm = _row_tile(n, x2.dtype)
    grid_m = pl.cdiv(n, tm)

    d_out_p = _pad_lanes(d_out)
    if d_out_p != d_out:
        w_t = jnp.pad(w_t, ((0, 0), (0, d_out_p - d_out)))
        b = jnp.pad(b, (0, d_out_p - d_out))

    w_bf = w_t.astype(jnp.bfloat16)
    b_f = b.astype(jnp.float32).reshape(1, d_out_p)

    out = pl.pallas_call(
        _linear_kernel,
        out_shape=jax.ShapeDtypeStruct((n, d_out_p), x.dtype),
        grid_spec=pltpu.PrefetchScalarGridSpec(
            num_scalar_prefetch=0,
            grid=(grid_m,),
            in_specs=[
                pl.BlockSpec((tm, d_in), lambda i: (i, 0)),
                pl.BlockSpec((d_in, d_out_p), lambda i: (0, 0)),
                pl.BlockSpec((1, d_out_p), lambda i: (0, 0)),
            ],
            out_specs=pl.BlockSpec((tm, d_out_p), lambda i: (i, 0)),
        ),
        compiler_params=pltpu.CompilerParams(
            dimension_semantics=("parallel",)),
    )(x2, w_bf, b_f)

    return out[:, :d_out].reshape(*lead, d_out)


# ------------------------- deterministic param init -------------------------

def _init_linear_params(key, in_features: int, out_features: int):
    """PyTorch nn.Linear default init: U(-1/sqrt(in), 1/sqrt(in)) for W and b."""
    kw, kb = jax.random.split(key)
    bound = 1.0 / jnp.sqrt(jnp.float32(in_features))
    # PyTorch weight is [out, in]; we store the transpose [in, out] for the kernel.
    w_t = jax.random.uniform(kw, (in_features, out_features), jnp.float32,
                             minval=-bound, maxval=bound)
    b = jax.random.uniform(kb, (out_features,), jnp.float32,
                           minval=-bound, maxval=bound)
    return w_t, b


# ----------------------------------- main -----------------------------------

if __name__ == "__main__":
    # Module config: input_size=32, hidden_size=64, output_size=16, activation="relu"
    batch, seq = 2, 8
    input_size, hidden_size, output_size = 32, 64, 16

    key = jax.random.PRNGKey(0)
    k_x, k_enc, k_dec, k_lin = jax.random.split(key, 4)

    x = jax.random.normal(k_x, (batch, seq, input_size), jnp.float32)

    # encoder / decoder params
    w1_t, b1 = _init_linear_params(k_enc, input_size, hidden_size)
    w2_t, b2 = _init_linear_params(k_dec, hidden_size, output_size)

    y = jax.block_until_ready(
        linear_encoder_decoder(x, w1_t, b1, w2_t, b2, activation="relu"))
    assert y.shape == (batch, seq, output_size), y.shape

    # Reference reproducing the kernel numerics (bf16 MXU operands, f32 acc).
    xb = x.astype(jnp.bfloat16)
    w1b = w1_t.astype(jnp.bfloat16)
    w2b = w2_t.astype(jnp.bfloat16)
    h_ref = jnp.maximum(
        jnp.einsum("bsi,ih->bsh", xb, w1b,
                   preferred_element_type=jnp.float32) + b1, 0.0)
    y_ref = jnp.einsum("bsh,ho->bso", h_ref.astype(jnp.bfloat16), w2b,
                       preferred_element_type=jnp.float32) + b2
    assert jnp.allclose(y, y_ref, atol=1e-4, rtol=1e-4), \
        float(jnp.max(jnp.abs(y - y_ref)))

    # hidden_size=None branch: single Linear
    w_t, b = _init_linear_params(k_lin, input_size, output_size)
    y2 = jax.block_until_ready(linear_only(x, w_t, b))
    y2_ref = jnp.einsum("bsi,io->bso", xb, w_t.astype(jnp.bfloat16),
                        preferred_element_type=jnp.float32) + b
    assert y2.shape == (batch, seq, output_size), y2.shape
    assert jnp.allclose(y2, y2_ref, atol=1e-4, rtol=1e-4), \
        float(jnp.max(jnp.abs(y2 - y2_ref)))

    print("KERNEL_OK")
</pallas_src>

<mosaic_0001>
module attributes {stable_mosaic.version = 11 : i64} {
  func.func @_enc_dec_kernel(%arg0: i32, %arg1: memref<8x32xf32, #tpu.memory_space<vmem>>, %arg2: memref<32x64xbf16, #tpu.memory_space<vmem>>, %arg3: memref<1x64xf32, #tpu.memory_space<vmem>>, %arg4: memref<64x128xbf16, #tpu.memory_space<vmem>>, %arg5: memref<1x128xf32, #tpu.memory_space<vmem>>, %arg6: memref<8x128xf32, #tpu.memory_space<vmem>>) attributes {dimension_semantics = [#tpu.dimension_semantics<parallel>], iteration_bounds = array<i64: 2>, scalar_prefetch = 0 : i64, scratch_operands = 0 : i64, tpu.core_type = #tpu.core_type<tc>, window_params = [{transform_indices = @transform_0, window_bounds = array<i64: 8, 32>}, {pipeline_mode = #tpu.pipeline_mode<synchronous>, transform_indices = @transform_1, window_bounds = array<i64: 32, 64>}, {pipeline_mode = #tpu.pipeline_mode<synchronous>, transform_indices = @transform_2, window_bounds = array<i64: 1, 64>}, {pipeline_mode = #tpu.pipeline_mode<synchronous>, transform_indices = @transform_3, window_bounds = array<i64: 64, 128>}, {pipeline_mode = #tpu.pipeline_mode<synchronous>, transform_indices = @transform_4, window_bounds = array<i64: 1, 128>}, {transform_indices = @transform_5, window_bounds = array<i64: 8, 128>}]} {
    %c0 = arith.constant 0 : index
    %c0_0 = arith.constant 0 : index
    %0 = vector.load %arg1[%c0, %c0_0] : memref<8x32xf32, #tpu.memory_space<vmem>>, vector<8x32xf32>
    %1 = arith.truncf %0 : vector<8x32xf32> to vector<8x32xbf16>
    %c0_1 = arith.constant 0 : index
    %c0_2 = arith.constant 0 : index
    %2 = vector.load %arg2[%c0_1, %c0_2] : memref<32x64xbf16, #tpu.memory_space<vmem>>, vector<32x64xbf16>
    %cst = arith.constant dense<0.000000e+00> : vector<8x64xf32>
    %3 = tpu.matmul %1, %2, %cst {dimension_numbers = #tpu.dot_dimension_numbers<[1], [0], [0], [1], [0, 0, 1, 1], [], []>} : vector<8x32xbf16>, vector<32x64xbf16>, vector<8x64xf32> -> vector<8x64xf32>
    %c0_3 = arith.constant 0 : index
    %c0_4 = arith.constant 0 : index
    %4 = vector.load %arg3[%c0_3, %c0_4] : memref<1x64xf32, #tpu.memory_space<vmem>>, vector<1x64xf32>
    %5 = vector.broadcast %4 : vector<1x64xf32> to vector<8x64xf32>
    %6 = arith.addf %3, %5 : vector<8x64xf32>
    %cst_5 = arith.constant 0.000000e+00 : f32
    %7 = vector.broadcast %cst_5 : f32 to vector<8x64xf32>
    %8 = arith.maximumf %6, %7 : vector<8x64xf32>
    %9 = arith.truncf %8 : vector<8x64xf32> to vector<8x64xbf16>
    %c0_6 = arith.constant 0 : index
    %c0_7 = arith.constant 0 : index
    %10 = vector.load %arg4[%c0_6, %c0_7] : memref<64x128xbf16, #tpu.memory_space<vmem>>, vector<64x128xbf16>
    %cst_8 = arith.constant dense<0.000000e+00> : vector<8x128xf32>
    %11 = tpu.matmul %9, %10, %cst_8 {dimension_numbers = #tpu.dot_dimension_numbers<[1], [0], [0], [1], [0, 0, 1, 1], [], []>} : vector<8x64xbf16>, vector<64x128xbf16>, vector<8x128xf32> -> vector<8x128xf32>
    %c0_9 = arith.constant 0 : index
    %c0_10 = arith.constant 0 : index
    %12 = vector.load %arg5[%c0_9, %c0_10] : memref<1x128xf32, #tpu.memory_space<vmem>>, vector<1x128xf32>
    %13 = vector.broadcast %12 : vector<1x128xf32> to vector<8x128xf32>
    %14 = arith.addf %11, %13 : vector<8x128xf32>
    %c0_11 = arith.constant 0 : index
    %c0_12 = arith.constant 0 : index
    %15 = vector.load %arg6[%c0_11, %c0_12] : memref<8x128xf32, #tpu.memory_space<vmem>>, vector<8x128xf32>
    tpu.vector_store %arg6[%c0_11, %c0_12], %14 {strides = array<i32>} : memref<8x128xf32, #tpu.memory_space<vmem>>, vector<8x128xf32>,
    return
  }
  func.func @transform_0(%arg0: i32) -> (i32, i32) {
    %c0_i32 = arith.constant 0 : i32
    %c0_i32_0 = arith.constant 0 : i32
    return %arg0, %c0_i32 : i32, i32
  }
  func.func @transform_1(%arg0: i32) -> (i32, i32) {
    %c0_i32 = arith.constant 0 : i32
    %c0_i32_0 = arith.constant 0 : i32
    %c0_i32_1 = arith.constant 0 : i32
    return %c0_i32, %c0_i32_0 : i32, i32
  }
  func.func @transform_2(%arg0: i32) -> (i32, i32) {
    %c0_i32 = arith.constant 0 : i32
    %c0_i32_0 = arith.constant 0 : i32
    %c0_i32_1 = arith.constant 0 : i32
    return %c0_i32, %c0_i32_0 : i32, i32
  }
  func.func @transform_3(%arg0: i32) -> (i32, i32) {
    %c0_i32 = arith.constant 0 : i32
    %c0_i32_0 = arith.constant 0 : i32
    %c0_i32_1 = arith.constant 0 : i32
    return %c0_i32, %c0_i32_0 : i32, i32
  }
  func.func @transform_4(%arg0: i32) -> (i32, i32) {
    %c0_i32 = arith.constant 0 : i32
    %c0_i32_0 = arith.constant 0 : i32
    %c0_i32_1 = arith.constant 0 : i32
    return %c0_i32, %c0_i32_0 : i32, i32
  }
  func.func @transform_5(%arg0: i32) -> (i32, i32) {
    %c0_i32 = arith.constant 0 : i32
    %c0_i32_0 = arith.constant 0 : i32
    return %arg0, %c0_i32 : i32, i32
  }
}

</mosaic_0001>

<bundles_post_ra>
// kernel: linear_encoder_decoder.1
= control target key start
LH: loop header
LB: loop body
LE: loop exit
PB: predicated region body
PF: predicated region fallthrough
CT: control target
= control target key end

     0   :  { %s532_s18 = smov 0   ;;  %s576_s0 = inlined_call_operand.vmem [shape: f32[16,32], index: 0, kind: input, shape index: {}]   ;;  %s577_s1 = inlined_call_operand.vmem [shape: bf16[32,64], index: 1, kind: input, shape index: {}]   ;;  %s578_s2 = inlined_call_operand.vmem [shape: f32[1,64], index: 2, kind: input, shape index: {}]   ;;  %s579_s3 = inlined_call_operand.vmem [shape: bf16[64,128], index: 3, kind: input, shape index: {}]   ;;  %s580_s4 = inlined_call_operand.vmem [shape: f32[1,128], index: 4, kind: input, shape index: {}]   ;;  %s581_s5 = inlined_call_operand.vmem [shape: f32[16,128], index: 5, kind: output, shape index: {}]  }
   0x1 LB: > { %s429_s19 = sadd.s32 4294967295, %s498_s18   ;;  %p433_p0 = scmp.ge.s32.totalorder %s498_s18, 1  ;;  %s498_s18 = sphi %s532_s18, %s15_s18  }
   0x2   : > { %p186_p1 = scmp.lt.s32.totalorder %s498_s18, 3 }
   0x4   : > { %p187_p2 = pnand %p433_p0, %p186_p1 }
   0x5   : > { %v486_v0 = vld [vmem:[%s577_s1] sm:$0xff] (!%p187_p2)   ;;  %v500_v1 = vmov (!%p187_p2), 0.0   ;;  %v487_v2 = vld [vmem:[%s577_s1 + $0x8] sm:$0xff] (!%p187_p2)   ;;  %vm501_vm0 = vmmov (!%p187_p2), 0   ;;  %p212_p3 = scmp.lt.s32.totalorder (!%p187_p2), %s429_s19, 1  ;;  %vm246_vm1 = vcmask (!%p187_p2), 261120  }
   0x6   : > { %190 = sbr.rel (%p187_p2) target bundleno = 452 (0x1c4), region = 40  ;;  %456 = vmatprep.subr.bf16.mxu0 (!%p187_p2), %v500_v1  ;;  %464 = vmatprep.subr.bf16.mxu1 (!%p187_p2), %v500_v1  ;;  %v488_v3 = vld [vmem:[%s579_s3] sm:$0xff] (!%p187_p2)   ;;  %v489_v4 = vld [vmem:[%s579_s3 + $0x8] sm:$0xff] (!%p187_p2)   ;;  %v490_v7 = vld [vmem:[%s579_s3 + $0x10] sm:$0xff] (!%p187_p2)   ;;  %vm331_vm2 = vcmask (!%p187_p2), 523264  }
   0x7   : > { %457 = vmatpush3.bf16.msra.mxu0 (!%p187_p2), %v486_v0  ;;  %460 = vmatprep.mubr.msk.bf16.mxu0 (!%p187_p2), %vm501_vm0, %v500_v1  ;;  %v491_v8 = vld [vmem:[%s579_s3 + $0x18] sm:$0xff] (!%p187_p2)   ;;  %v436_v9 = vld [vmem:[%s578_s2] ss:$0 sm:$0xff] (!%p187_p2) }
   0x8   : > { %458 = vmatprep.subr.bf16.mxu0 (!%p187_p2), %v500_v1  ;;  %472 = vmatprep.mubr.msk.bf16.mxu1 (!%p187_p2), %vm501_vm0, %v500_v1  ;;  %v440_v17 = vld [vmem:[%s580_s4] ss:$0 sm:$0xff] (!%p187_p2) }
   0x9   : > { %465 = vmatpush3.bf16.msra.mxu1 (!%p187_p2), %v488_v3 }
   0xa   : > { %466 = vmatprep.subr.bf16.mxu1 (!%p187_p2), %v500_v1 }
   0xb   : > { %459 = vmatpush3.bf16.msra.mxu0 (!%p187_p2), %v487_v2 }
   0xd   : > { %s583_s19 = smov (!%p212_p3, %s429_s19), 1  ;;  %467 = vmatpush3.bf16.msra.mxu1 %v489_v4 }
   0xe   : > { %s434_s28 = sshll.u32 %s583_s19, 3  ;;  %468 = vmatprep.subr.bf16.mxu1 %v500_v1 }
   0xf   : > { %s215_s6 = scalar_lea.vmem %s576_s0, %s434_s28  ;;  %s219_s17 = scalar_lea.vmem %s581_s5, %s434_s28 }
  0x10   : > { %v221_v5 = vld [vmem:[%s215_s6] sm:$0xff] }
  0x11   : > { %v222_v6 = vpack.c.bf16 %v221_v5, %v221_v5  ;;  %469 = vmatpush3.bf16.msra.mxu1 %v490_v7 }
  0x12   : > { %470 = vmatprep.subr.bf16.mxu1 %v500_v1 }
  0x13   : > { %461 = vmatmul.mubr.msk.bf16.vlgmr.msra.gmra.mrb[0].mxu0 %vm246_vm1, %v222_v6 }
  0x15   : > { %471 = vmatpush3.bf16.msra.mxu1 %v491_v8 }
  0xe6   : > { %v284_v10 = vpop.f32.mrb[0].mxu0 }
  0xe7   : > { %v285_v11 = vadd.f32 %v436_v9, %v284_v10  ;;  %v462_v12 = vpop.f32.mrb[1].mxu0 }
  0xe8   : > { %v287_v13 = vpop.f32.mrb[2].mxu0 }
  0xe9   : > { %v290_v14 = vmax.f32 %v285_v11, 0.0  ;;  %v463_v15 = vpop.f32.mrb[3].mxu0 }
  0xeb   : > { %v291_v16 = vpack.c.bf16 %v290_v14, %v290_v14 }
  0xed   : > { %473 = vmatmul.mubr.msk.bf16.vlgmr.msra.gmra.mrb[0].mxu1 %vm331_vm2, %v291_v16 }
 0x1c0   : > { %v369_v18 = vpop.f32.mrb[0].mxu1 }
 0x1c1   : > { %v370_v19 = vadd.f32 %v440_v17, %v369_v18  ;;  %v474_v20 = vpop.f32.mrb[1].mxu1 }
 0x1c2   : > { %v372_v21 = vpop.f32.mrb[2].mxu1 }
 0x1c3   : > { %375 = vst [vmem:[%s219_s17] sm:$0xff] %v370_v19  ;;  %v475_v22 = vpop.f32.mrb[3].mxu1 }
 0x1c4 PF: > { %s15_s18 = sadd.s32 1, %s498_s18  }
 0x1c5   : > { %p12_p4 = scmp.ge.s32.totalorder %s15_s18, 4  }
 0x1c7   :  { %14 = sbr.rel (!%p12_p4) target bundleno = 1 (0x1), region = 70 }

</bundles_post_ra>
